<compile_context>
chip_gen: v7x
topology: tpu7x:2x2x1
jax: 0.10.0
libtpu: 0.0.40
codegen_flags: <defaults>
</compile_context>

<pallas_src>
import jax
import jax.numpy as jnp
from jax import lax
from jax.experimental import pallas as pl
from jax.experimental.pallas import tpu as pltpu


def _row_loop(T, body):
    """Static unroll for small tiles (LLO visibility), fori_loop otherwise."""
    if T <= 64:
        for r in range(T):
            body(r)
    else:
        lax.fori_loop(0, T, lambda r, c: (body(r), c)[1], None)


# ---------------------------------------------------------------------------
# Path 1: embedding table resident in VMEM (table fits the VMEM budget).
# ---------------------------------------------------------------------------
def _resident_kernel(ids_ref, emb_ref, pos_ref, out_ref, gather_buf):
    """One grid step = T tokens of one batch row.

    ids_ref    : (B*S_pad,) int32   SMEM (scalar prefetch)
    emb_ref    : (V, D)             VMEM (resident: constant index map)
    pos_ref    : (T, D) f32         VMEM
    out_ref    : (1, T, D)          VMEM
    gather_buf : (T, D) table dtype VMEM scratch
    """
    T = gather_buf.shape[0]
    s, b = pl.program_id(0), pl.program_id(1)
    s_pad = pl.num_programs(0) * T
    base = b * s_pad + s * T

    def gather_row(r):
        tok = ids_ref[base + r]
        gather_buf[pl.ds(r, 1), :] = emb_ref[pl.ds(tok, 1), :]

    _row_loop(T, gather_row)

    # tok_emb + pos_emb in f32, then cast (dropout = identity in eval mode).
    out_ref[0] = (gather_buf[...].astype(jnp.float32)
                  + pos_ref[...]).astype(out_ref.dtype)


# ---------------------------------------------------------------------------
# Path 2: HBM row-gather, shared-semaphore aggregate wait, double-buffered
# across grid steps.
# ---------------------------------------------------------------------------
def _hbm_gather_kernel(ids_ref, emb_hbm, pos_ref, out_ref, bufs, sems):
    """ids_ref : (B*S_pad,) int32 SMEM (scalar prefetch)
    emb_hbm : (V, D)              HBM  (memory_space=pl.ANY, manual DMA)
    pos_ref : (T, D) f32          VMEM
    out_ref : (1, T, D)           VMEM
    bufs    : (2, T, D)           VMEM scratch (gather double buffer)
    sems    : (2,) DMA semaphores (one per slot, shared by all T row copies)
    """
    T = bufs.shape[1]
    n_b = pl.num_programs(1)
    s_pad = pl.num_programs(0) * T
    step = pl.program_id(0) * n_b + pl.program_id(1)
    n_steps = pl.num_programs(0) * n_b

    def issue(tile_step, slot):
        s_i = tile_step // n_b
        b_i = tile_step % n_b
        base = b_i * s_pad + s_i * T

        def issue_row(r):
            tok = ids_ref[base + r]
            pltpu.make_async_copy(
                emb_hbm.at[pl.ds(tok, 1), :],
                bufs.at[slot, pl.ds(r, 1), :],
                sems.at[slot],                 # all T rows signal the same sem
            ).start()

        _row_loop(T, issue_row)

    # Prime: the first grid step issues its own tile into slot 0.
    @pl.when(step == 0)
    def _():
        issue(step, 0)

    # Prefetch the next tile into the other slot before waiting on this one.
    @pl.when(step + 1 < n_steps)
    def _():
        issue(step + 1, (step + 1) % 2)

    slot = step % 2
    # Aggregate wait: one descriptor sized for the whole (T, D) slot consumes
    # the T row-copy completions on the shared semaphore.
    pltpu.make_async_copy(bufs.at[slot], bufs.at[slot], sems.at[slot]).wait()

    out_ref[0] = (bufs[slot].astype(jnp.float32)
                  + pos_ref[...]).astype(out_ref.dtype)


# ---------------------------------------------------------------------------
# Wrapper
# ---------------------------------------------------------------------------
def _round_up(x, m):
    return (x + m - 1) // m * m


def _seq_tiling(seq_len, max_tile, multiple):
    """Pick (T, S_pad): T a multiple of `multiple`, <= ~max_tile, T | S_pad >= S."""
    n_tiles = -(-seq_len // max_tile)
    t = _round_up(-(-seq_len // n_tiles), multiple)
    return t, t * n_tiles


def transformer_embedding(ids, emb_table, pos_enc, *, out_dtype=None,
                          max_token_tile=256,
                          table_vmem_budget_bytes=32 * 1024 * 1024,
                          interpret=False):
    """ids: [B, S] int; emb_table: [V, D]; pos_enc: [max_len, D] -> [B, S, D]."""
    B, S = ids.shape
    V, D = emb_table.shape
    if out_dtype is None:
        out_dtype = emb_table.dtype

    itemsize = jnp.dtype(emb_table.dtype).itemsize
    out_itemsize = jnp.dtype(out_dtype).itemsize
    sub_mult = 8 if itemsize >= 4 else 16
    T, S_pad = _seq_tiling(S, max_token_tile, sub_mult)
    n_seq_tiles = S_pad // T

    # Pad ids along the sequence with the padding index 0 (sliced off below).
    if S_pad != S:
        ids = jnp.pad(ids, ((0, 0), (0, S_pad - S)))
    ids_flat = ids.reshape(B * S_pad).astype(jnp.int32)

    # Positional encoding, kept f32 so the add matches the f32 reference.
    pos = pos_enc[:S, :].astype(jnp.float32)
    if S_pad != S:
        pos = jnp.pad(pos, ((0, S_pad - S), (0, 0)))

    grid = (n_seq_tiles, B)   # seq outer, batch inner -> pos tile resident over batch

    table_bytes = V * D * itemsize
    resident = table_bytes <= table_vmem_budget_bytes

    tile_bytes = T * D * (2 * 4 + 2 * out_itemsize)   # double-buffered pos + out tiles
    if resident:
        vmem_need = 2 * table_bytes + tile_bytes + T * D * itemsize
    else:
        vmem_need = tile_bytes + 2 * T * D * itemsize
    vmem_limit = int(min(128 * 1024 * 1024,
                         max(32 * 1024 * 1024, vmem_need + (4 << 20))))

    pos_spec = pl.BlockSpec((T, D), lambda s, b, ids_s: (s, 0))
    out_spec = pl.BlockSpec((1, T, D), lambda s, b, ids_s: (b, s, 0))

    if resident:
        kernel = _resident_kernel
        # Table DMA'd into VMEM once (constant block index) and reused.
        emb_spec = pl.BlockSpec((V, D), lambda s, b, ids_s: (0, 0))
        scratch = [pltpu.VMEM((T, D), emb_table.dtype)]
        dim_sem = ("parallel", "arbitrary")
    else:
        kernel = _hbm_gather_kernel
        emb_spec = pl.BlockSpec(memory_space=pl.ANY)   # raw HBM ref, manual DMA
        scratch = [pltpu.VMEM((2, T, D), emb_table.dtype),
                   pltpu.SemaphoreType.DMA((2,))]
        # Gather double-buffer carries state across steps -> keep grid sequential.
        dim_sem = ("arbitrary", "arbitrary")

    out = pl.pallas_call(
        kernel,
        out_shape=jax.ShapeDtypeStruct((B, S_pad, D), out_dtype),
        grid_spec=pltpu.PrefetchScalarGridSpec(
            num_scalar_prefetch=1,          # ids -> SMEM, readable in-kernel
            grid=grid,
            in_specs=[emb_spec, pos_spec],
            out_specs=out_spec,
            scratch_shapes=scratch,
        ),
        compiler_params=pltpu.CompilerParams(
            dimension_semantics=dim_sem,
            vmem_limit_bytes=vmem_limit,
        ),
        interpret=interpret,
    )(ids_flat, emb_table, pos)

    return out[:, :S, :]


def make_positional_encoding(max_len, d_model):
    """Sinusoid encoding, identical to AbsolutePositionalEncoding.__init__."""
    pos = jnp.arange(max_len, dtype=jnp.float32)[:, None]            # (L, 1)
    two_i = jnp.arange(0, d_model, 2, dtype=jnp.float32)             # (D/2,)
    angle = pos / (10000.0 ** (two_i / d_model))                     # (L, D/2)
    enc = jnp.zeros((max_len, d_model), dtype=jnp.float32)
    enc = enc.at[:, 0::2].set(jnp.sin(angle))
    enc = enc.at[:, 1::2].set(jnp.cos(angle))
    return enc


if __name__ == "__main__":
    # Small shapes consistent with the module's forward; d_model a multiple
    # of 128 so output stores are lane-dense.
    vocab_size = 64
    d_model = 128
    max_len = 16
    batch = 2
    seq_len = 8
    drop_prob = 0.1   # dropout is identity in eval mode

    key = jax.random.PRNGKey(0)
    k_emb, k_ids = jax.random.split(key)

    # nn.Embedding init: N(0, 1); padding_idx=0 -> row 0 zeroed.
    emb_table = jax.random.normal(k_emb, (vocab_size, d_model), dtype=jnp.float32)
    emb_table = emb_table.at[0, :].set(0.0)

    pos_enc = make_positional_encoding(max_len, d_model)
    ids = jax.random.randint(k_ids, (batch, seq_len), 0, vocab_size, dtype=jnp.int32)

    # Pure-JAX reference.
    ref = jnp.take(emb_table, ids, axis=0) + pos_enc[None, :seq_len, :]

    # Primary path: VMEM-resident embedding table.
    out = transformer_embedding(ids, emb_table, pos_enc)
    out = jax.block_until_ready(out)
    assert out.shape == (batch, seq_len, d_model)
    assert jnp.allclose(out, ref, atol=1e-6, rtol=1e-6)

    # Fallback path: HBM row-gather (shared-sem aggregate wait, double-buffered).
    out_hbm = transformer_embedding(ids, emb_table, pos_enc,
                                    table_vmem_budget_bytes=0)
    out_hbm = jax.block_until_ready(out_hbm)
    assert jnp.allclose(out_hbm, ref, atol=1e-6, rtol=1e-6)

    print("KERNEL_OK")
</pallas_src>

<mosaic_0001>
module attributes {stable_mosaic.version = 11 : i64} {
  func.func @_resident_kernel(%arg0: i32, %arg1: i32, %arg2: memref<16xi32, #tpu.memory_space<smem>>, %arg3: memref<64x128xf32, #tpu.memory_space<vmem>>, %arg4: memref<8x128xf32, #tpu.memory_space<vmem>>, %arg5: memref<1x8x128xf32, #tpu.memory_space<vmem>>, %arg6: memref<8x128xf32, #tpu.memory_space<vmem>>) attributes {dimension_semantics = [#tpu.dimension_semantics<parallel>, #tpu.dimension_semantics<arbitrary>], iteration_bounds = array<i64: 1, 2>, scalar_prefetch = 1 : i64, scratch_operands = 1 : i64, tpu.core_type = #tpu.core_type<tc>, window_params = [{pipeline_mode = #tpu.pipeline_mode<synchronous>, transform_indices = @transform_0, window_bounds = array<i64: 64, 128>}, {transform_indices = @transform_1, window_bounds = array<i64: 8, 128>}, {transform_indices = @transform_2, window_bounds = array<i64: 1, 8, 128>}]} {
    %c8_i32 = arith.constant 8 : i32
    %0 = arith.muli %arg1, %c8_i32 : i32
    %c8_i32_0 = arith.constant 8 : i32
    %1 = arith.muli %arg0, %c8_i32_0 : i32
    %2 = arith.addi %0, %1 : i32
    %c0_i32 = arith.constant 0 : i32
    %3 = arith.addi %2, %c0_i32 : i32
    %4 = arith.index_cast %3 : i32 to index
    %5 = memref.load %arg2[%4] : memref<16xi32, #tpu.memory_space<smem>>
    %6 = arith.index_cast %5 : i32 to index
    %c0 = arith.constant 0 : index
    %7 = vector.load %arg3[%6, %c0] : memref<64x128xf32, #tpu.memory_space<vmem>>, vector<1x128xf32>
    %c0_1 = arith.constant 0 : index
    %c0_2 = arith.constant 0 : index
    %8 = vector.load %arg6[%c0_1, %c0_2] : memref<8x128xf32, #tpu.memory_space<vmem>>, vector<1x128xf32>
    tpu.vector_store %arg6[%c0_1, %c0_2], %7 {strides = array<i32>} : memref<8x128xf32, #tpu.memory_space<vmem>>, vector<1x128xf32>,
    %c1_i32 = arith.constant 1 : i32
    %9 = arith.addi %2, %c1_i32 : i32
    %10 = arith.index_cast %9 : i32 to index
    %11 = memref.load %arg2[%10] : memref<16xi32, #tpu.memory_space<smem>>
    %12 = arith.index_cast %11 : i32 to index
    %c0_3 = arith.constant 0 : index
    %13 = vector.load %arg3[%12, %c0_3] : memref<64x128xf32, #tpu.memory_space<vmem>>, vector<1x128xf32>
    %c1 = arith.constant 1 : index
    %c0_4 = arith.constant 0 : index
    %14 = vector.load %arg6[%c1, %c0_4] : memref<8x128xf32, #tpu.memory_space<vmem>>, vector<1x128xf32>
    tpu.vector_store %arg6[%c1, %c0_4], %13 {strides = array<i32>} : memref<8x128xf32, #tpu.memory_space<vmem>>, vector<1x128xf32>,
    %c2_i32 = arith.constant 2 : i32
    %15 = arith.addi %2, %c2_i32 : i32
    %16 = arith.index_cast %15 : i32 to index
    %17 = memref.load %arg2[%16] : memref<16xi32, #tpu.memory_space<smem>>
    %18 = arith.index_cast %17 : i32 to index
    %c0_5 = arith.constant 0 : index
    %19 = vector.load %arg3[%18, %c0_5] : memref<64x128xf32, #tpu.memory_space<vmem>>, vector<1x128xf32>
    %c2 = arith.constant 2 : index
    %c0_6 = arith.constant 0 : index
    %20 = vector.load %arg6[%c2, %c0_6] : memref<8x128xf32, #tpu.memory_space<vmem>>, vector<1x128xf32>
    tpu.vector_store %arg6[%c2, %c0_6], %19 {strides = array<i32>} : memref<8x128xf32, #tpu.memory_space<vmem>>, vector<1x128xf32>,
    %c3_i32 = arith.constant 3 : i32
    %21 = arith.addi %2, %c3_i32 : i32
    %22 = arith.index_cast %21 : i32 to index
    %23 = memref.load %arg2[%22] : memref<16xi32, #tpu.memory_space<smem>>
    %24 = arith.index_cast %23 : i32 to index
    %c0_7 = arith.constant 0 : index
    %25 = vector.load %arg3[%24, %c0_7] : memref<64x128xf32, #tpu.memory_space<vmem>>, vector<1x128xf32>
    %c3 = arith.constant 3 : index
    %c0_8 = arith.constant 0 : index
    %26 = vector.load %arg6[%c3, %c0_8] : memref<8x128xf32, #tpu.memory_space<vmem>>, vector<1x128xf32>
    tpu.vector_store %arg6[%c3, %c0_8], %25 {strides = array<i32>} : memref<8x128xf32, #tpu.memory_space<vmem>>, vector<1x128xf32>,
    %c4_i32 = arith.constant 4 : i32
    %27 = arith.addi %2, %c4_i32 : i32
    %28 = arith.index_cast %27 : i32 to index
    %29 = memref.load %arg2[%28] : memref<16xi32, #tpu.memory_space<smem>>
    %30 = arith.index_cast %29 : i32 to index
    %c0_9 = arith.constant 0 : index
    %31 = vector.load %arg3[%30, %c0_9] : memref<64x128xf32, #tpu.memory_space<vmem>>, vector<1x128xf32>
    %c4 = arith.constant 4 : index
    %c0_10 = arith.constant 0 : index
    %32 = vector.load %arg6[%c4, %c0_10] : memref<8x128xf32, #tpu.memory_space<vmem>>, vector<1x128xf32>
    tpu.vector_store %arg6[%c4, %c0_10], %31 {strides = array<i32>} : memref<8x128xf32, #tpu.memory_space<vmem>>, vector<1x128xf32>,
    %c5_i32 = arith.constant 5 : i32
    %33 = arith.addi %2, %c5_i32 : i32
    %34 = arith.index_cast %33 : i32 to index
    %35 = memref.load %arg2[%34] : memref<16xi32, #tpu.memory_space<smem>>
    %36 = arith.index_cast %35 : i32 to index
    %c0_11 = arith.constant 0 : index
    %37 = vector.load %arg3[%36, %c0_11] : memref<64x128xf32, #tpu.memory_space<vmem>>, vector<1x128xf32>
    %c5 = arith.constant 5 : index
    %c0_12 = arith.constant 0 : index
    %38 = vector.load %arg6[%c5, %c0_12] : memref<8x128xf32, #tpu.memory_space<vmem>>, vector<1x128xf32>
    tpu.vector_store %arg6[%c5, %c0_12], %37 {strides = array<i32>} : memref<8x128xf32, #tpu.memory_space<vmem>>, vector<1x128xf32>,
    %c6_i32 = arith.constant 6 : i32
    %39 = arith.addi %2, %c6_i32 : i32
    %40 = arith.index_cast %39 : i32 to index
    %41 = memref.load %arg2[%40] : memref<16xi32, #tpu.memory_space<smem>>
    %42 = arith.index_cast %41 : i32 to index
    %c0_13 = arith.constant 0 : index
    %43 = vector.load %arg3[%42, %c0_13] : memref<64x128xf32, #tpu.memory_space<vmem>>, vector<1x128xf32>
    %c6 = arith.constant 6 : index
    %c0_14 = arith.constant 0 : index
    %44 = vector.load %arg6[%c6, %c0_14] : memref<8x128xf32, #tpu.memory_space<vmem>>, vector<1x128xf32>
    tpu.vector_store %arg6[%c6, %c0_14], %43 {strides = array<i32>} : memref<8x128xf32, #tpu.memory_space<vmem>>, vector<1x128xf32>,
    %c7_i32 = arith.constant 7 : i32
    %45 = arith.addi %2, %c7_i32 : i32
    %46 = arith.index_cast %45 : i32 to index
    %47 = memref.load %arg2[%46] : memref<16xi32, #tpu.memory_space<smem>>
    %48 = arith.index_cast %47 : i32 to index
    %c0_15 = arith.constant 0 : index
    %49 = vector.load %arg3[%48, %c0_15] : memref<64x128xf32, #tpu.memory_space<vmem>>, vector<1x128xf32>
    %c7 = arith.constant 7 : index
    %c0_16 = arith.constant 0 : index
    %50 = vector.load %arg6[%c7, %c0_16] : memref<8x128xf32, #tpu.memory_space<vmem>>, vector<1x128xf32>
    tpu.vector_store %arg6[%c7, %c0_16], %49 {strides = array<i32>} : memref<8x128xf32, #tpu.memory_space<vmem>>, vector<1x128xf32>,
    %c0_17 = arith.constant 0 : index
    %c0_18 = arith.constant 0 : index
    %51 = vector.load %arg6[%c0_17, %c0_18] : memref<8x128xf32, #tpu.memory_space<vmem>>, vector<8x128xf32>
    %c0_19 = arith.constant 0 : index
    %c0_20 = arith.constant 0 : index
    %52 = vector.load %arg4[%c0_19, %c0_20] : memref<8x128xf32, #tpu.memory_space<vmem>>, vector<8x128xf32>
    %53 = arith.addf %51, %52 : vector<8x128xf32>
    %c0_21 = arith.constant 0 : index
    %c0_22 = arith.constant 0 : index
    %c0_23 = arith.constant 0 : index
    %54 = vector.load %arg5[%c0_21, %c0_22, %c0_23] : memref<1x8x128xf32, #tpu.memory_space<vmem>>, vector<1x8x128xf32>
    %55 = vector.shape_cast %54 : vector<1x8x128xf32> to vector<8x128xf32>
    %56 = vector.shape_cast %53 : vector<8x128xf32> to vector<1x8x128xf32>
    tpu.vector_store %arg5[%c0_21, %c0_22, %c0_23], %56 {strides = array<i32>} : memref<1x8x128xf32, #tpu.memory_space<vmem>>, vector<1x8x128xf32>,
    return
  }
  func.func @transform_0(%arg0: i32, %arg1: i32, %arg2: memref<16xi32, #tpu.memory_space<smem>>) -> (i32, i32) {
    %c0_i32 = arith.constant 0 : i32
    %c0_i32_0 = arith.constant 0 : i32
    %c0_i32_1 = arith.constant 0 : i32
    return %c0_i32, %c0_i32_0 : i32, i32
  }
  func.func @transform_1(%arg0: i32, %arg1: i32, %arg2: memref<16xi32, #tpu.memory_space<smem>>) -> (i32, i32) {
    %c0_i32 = arith.constant 0 : i32
    %c0_i32_0 = arith.constant 0 : i32
    return %arg0, %c0_i32 : i32, i32
  }
  func.func @transform_2(%arg0: i32, %arg1: i32, %arg2: memref<16xi32, #tpu.memory_space<smem>>) -> (i32, i32, i32) {
    %c0_i32 = arith.constant 0 : i32
    %c0_i32_0 = arith.constant 0 : i32
    return %arg1, %arg0, %c0_i32 : i32, i32, i32
  }
}

</mosaic_0001>

<bundles_post_ra>
// kernel: tpu_custom_call.1
= control target key start
LH: loop header
LB: loop body
LE: loop exit
PB: predicated region body
PF: predicated region fallthrough
CT: control target
= control target key end

     0   :  { %s795_s0 = inlined_call_operand.hbm [shape: s32[16], index: 0, kind: input, shape index: {}]   ;;  %s796_s1 = inlined_call_operand.hbm [shape: f32[64,128], index: 1, kind: input, shape index: {}]   ;;  %s797_s2 = inlined_call_operand.hbm [shape: f32[8,128], index: 2, kind: input, shape index: {}]   ;;  %s798_s3 = inlined_call_operand.hbm [shape: f32[2,8,128], index: 3, kind: output, shape index: {}]  }
   0x1   :  { %s418_s14 = scalar_lea.hbm %s795_s0, 16 }
   0x2   :  { %p419_p0 = scmp.ne.s32.totalorder %s795_s0, %s418_s14  ;;  %p422_p1 = scmp.lt.u32.totalorder %s418_s14, %s795_s0 }
   0x4   :  { %p424_p2 = pnand %p422_p1, %p419_p0 }
   0x6   :  { %427 = shalt.err (!%p424_p2)  }
   0x7   :  { %s574_s19 = smov [#allocation4]  }
   0x8   :  { %9 = dma.hbm_to_smem %s795_s0, 16, %s574_s19, [#allocation3] }
   0x9   :  { %536 = dma.done.wait [#allocation3], 16 }
   0xa   :  { %537 = vsyncadd [#allocation3], 4294967280 }
   0xb   :  { %11 = sfence }
   0xc   :  { %12 = vsyncpa [#allocation6], 0 }
   0xd   :  { %13 = vsyncpa [#allocation9], 0 }
   0xe   :  { %14 = vsyncpa [#allocation7], 0 }
   0xf   :  { %16 = vsyncpa [#allocation7 + $0x1], 0  ;;  %s612_s22 = smov 0   ;;  %s614_s23 = smov 0  }
  0x10   :  { %s616_s24 = smov 0   ;;  %s618_s25 = smov 0  }
  0x11   :  { %s620_s26 = smov 0   ;;  %s622_s27 = smov 0  }
  0x12 LB: > { %s325_s0 = sadd.s32 4294967295, %s572_s27   ;;  %s326_s28 = sadd.s32 4294967294, %s572_s27   ;;  %s572_s27 = sphi %s622_s27, %s22_s27   ;;  %s568_s26 = sphi %s620_s26, %s816_s26   ;;  %s564_s25 = sphi %s618_s25, %s815_s25   ;;  %s560_s24 = sphi %s616_s24, %s814_s24   ;;  %s556_s23 = sphi %s614_s23, %s813_s23   ;;  %s552_s22 = sphi %s612_s22, %s812_s22  }
  0x13   : > { %s31_s29 = sadd.s32 1, %s568_s26  ;;  %s90_s30 = sadd.s32 1, %s560_s24 }
  0x14   : > { %p32_p3 = scmp.ge.s32.totalorder %s31_s29, 2  ;;  %p100_p4 = scmp.ne.s32.totalorder %s560_s24, %s556_s23 }
  0x15   : > { %p101_p5 = scmp.eq.s32.totalorder %s325_s0, 1  ;;  %p106_p6 = scmp.ne.s32.totalorder %s556_s23, %s552_s22 }
  0x16   : > { %s818_s29 = smov (%p32_p3, %s31_s29), 0  ;;  %p107_p8 = scmp.eq.s32.totalorder %s326_s28, 1 }
  0x17   : > { %p652_p7 = por %p101_p5, %p100_p4  ;;  %s85_s5 = ssub.s32 %s568_s26, %s818_s29 }
  0x18   : > { %p327_p9 = scmp.ge.s32.totalorder %s572_s27, 1  ;;  %p88_p10 = scmp.eq.s32.totalorder %s85_s5, 0 }
  0x19   : > { %s803_s4 = scalar_select %p652_p7, 1, 0 }
  0x1a   : > { %p659_p11 = por %p107_p8, %p106_p6  ;;  %p114_p12 = scmp.lt.s32.totalorder %s572_s27, 3 }
  0x1b   : > { %s665_s7 = scalar_select %p88_p10, %s560_s24, %s90_s30  }
  0x1c   : > { %s804_s6 = scalar_select %p659_p11, 1, 0 }
  0x1d   : > { %p667_p13 = pnand %p327_p9, %p114_p12  ;;  %p671_p0 = scmp.eq.s32.totalorder %s325_s0, 0 }
  0x1e   : > { %s575_s10 = smov [#allocation5]   ;;  %s576_s13 = smov [#allocation8]  }
  0x1f   : > { %s805_s8 = scalar_select %p667_p13, 1, 0 }
  0x20   : > { %s806_s9 = scalar_select %p671_p0, 1, 0 }
  0x21   : > { %p349_p1 = pneg %p667_p13  ;;  %s126_s11 = sshll.u32 %s575_s10, 4  ;;  %s127_s11 = int_to_ptr.vmem [resolvable:$true] %s126_s11 }
  0x22   : > { %s142_s14 = sshll.u32 %s576_s13, 4  ;;  %s428_s17 = scalar_lea.hbm %s796_s1, 1024  ;;  %s683_s14 = int_to_ptr.vmem [resolvable:$true] %s142_s14 }
  0x23   : > { %p679_p2 = pnand %p671_p0, %p349_p1  ;;  %p429_p3 = scmp.ne.s32.totalorder %s796_s1, %s428_s17 }
  0x24   : > { %p435_p8 = scmp.lt.u32.totalorder %s428_s17, %s796_s1 }
  0x25   : > { %p430_p4 = pneg %p679_p2 }
  0x27   : > { %p431_p5 = pnand %p430_p4, %p429_p3 }
  0x29   : > { %p432_p6 = pneg %p431_p5 }
  0x2b   : > { %p437_p9 = pnand %p435_p8, %p432_p6 }
  0x2d   : > { %440 = shalt.err (!%p437_p9)
}
  0x2e   : > { %s441_s0 = scalar_lea.vmem %s127_s11, 1024  ;;  %p449_p11 = scmp.lt.s32.totalorder %s127_s11, %s127_s11 }
  0x2f   : > { %p442_p10 = scmp.ne.s32.totalorder %s127_s11, %s441_s0  ;;  %p450_p7 = scmp.lt.s32.totalorder %s441_s0, %s441_s0 }
  0x31   : > { %p444_p12 = pnand %p442_p10, %p430_p4  ;;  %p451_p0 = por %p450_p7, %p449_p11 }
  0x33   : > { %p445_p1 = pneg %p444_p12 }
  0x35   : > { %p452_p13 = pnand %p451_p0, %p445_p1 }
  0x37   : > { %455 = shalt.err (!%p452_p13)
}
  0x38   : > { %s577_s28 = smov 128   ;;  %s578_s30 = smov 8  }
  0x39   : > { %352 = dma.hbm_to_vmem [thread:$0]  (!%p679_p2), %s796_s1, 1024, %s127_s11, [#allocation6], %s577_s28, %s577_s28, %s578_s30  }
  0x3a   : > { %s456_s16 = scalar_lea.hbm %s797_s2, 128 }
  0x3b   : > { %p457_p3 = scmp.ne.s32.totalorder %s797_s2, %s456_s16  ;;  %p463_p13 = scmp.lt.u32.totalorder %s456_s16, %s797_s2 }
  0x3d   : > { %p459_p7 = pnand %p457_p3, %p430_p4 }
  0x3f   : > { %p460_p11 = pneg %p459_p7 }
  0x41   : > { %p465_p0 = pnand %p463_p13, %p460_p11 }
  0x43   : > { %468 = shalt.err (!%p465_p0)
}
  0x44   : > { %s469_s11 = scalar_lea.vmem %s683_s14, 128  ;;  %p477_p9 = scmp.lt.s32.totalorder %s683_s14, %s683_s14 }
  0x45   : > { %p470_p5 = scmp.ne.s32.totalorder %s683_s14, %s469_s11  ;;  %p478_p10 = scmp.lt.s32.totalorder %s469_s11, %s469_s11 }
  0x47   : > { %p472_p6 = pnand %p470_p5, %p430_p4  ;;  %p479_p12 = por %p478_p10, %p477_p9 }
  0x49   : > { %p473_p8 = pneg %p472_p6 }
  0x4b   : > { %p480_p1 = pnand %p479_p12, %p473_p8 }
  0x4d   : > { %483 = shalt.err (!%p480_p1)
}
  0x4e   : > { %355 = dma.hbm_to_vmem [thread:$0]  (!%p679_p2), %s797_s2, 128, %s683_s14, [#allocation9]  }
  0x4f   : > { %p808_p3 = scmp.ne.s32.totalorder %s805_s8, 0 }
  0x50   : > { %p809_p7 = scmp.ne.s32.totalorder (!%p808_p3), %s806_s9, 0 }
  0x51   : > { %155 = sbr.rel (%p808_p3) target bundleno = 132 (0x84), region = 28 }
  0x58   : > { %539 = dma.done.wait (%p809_p7), [#allocation6], 1024  }
  0x59   : > { %541 = vsyncadd (%p809_p7), [#allocation6], 4294966272 }
  0x5a   : > { %543 = dma.done.wait (%p809_p7), [#allocation9], 128  }
  0x5b   : > { %545 = vsyncadd (%p809_p7), [#allocation9], 4294967168  ;;  %s334_s12 = sshll.u32 %s564_s25, 3  ;;  %v219_v8 = vld [vmem:[#allocation8] sm:$0xff]  ;;  %p810_p4 = scmp.ne.s32.totalorder %s803_s4, 0 }
  0x5c   : > { %s179_s28 = sld [smem:[#allocation4 + %s334_s12]]  ;;  %s183_s30 = sadd.s32 1, %s334_s12 }
  0x5d   : > { %s184_s14 = sld [smem:[#allocation4 + %s183_s30]]  ;;  %s188_s5 = sadd.s32 2, %s334_s12 }
  0x5e   : > { %s189_s8 = sld [smem:[#allocation4 + %s188_s5]]  ;;  %s193_s10 = sadd.s32 3, %s334_s12 }
  0x5f   : > { %s194_s13 = sld [smem:[#allocation4 + %s193_s10]]  ;;  %s198_s15 = sadd.s32 4, %s334_s12 }
  0x60   : > { %s199_s16 = sld [smem:[#allocation4 + %s198_s15]]  ;;  %s203_s17 = sadd.s32 5, %s334_s12 }
  0x61   : > { %s204_s18 = sld [smem:[#allocation4 + %s203_s17]]  ;;  %s208_s19 = sadd.s32 6, %s334_s12 }
  0x62   : > { %s209_s20 = sld [smem:[#allocation4 + %s208_s19]]  ;;  %s180_s11 = scalar_lea.vmem [#allocation5], %s179_s28 }
  0x63   : > { %v181_v0 = vld [vmem:[%s180_s11] sm:$0x1]  ;;  %s213_s21 = sadd.s32 7, %s334_s12  ;;  %s185_s9 = scalar_lea.vmem [#allocation5], %s184_s14 }
  0x64   : > { %182 = vst [vmem:[#allocation2] sm:$0x1] %v181_v0  ;;  %v186_v1 = vld [vmem:[%s185_s9] sm:$0x1]  ;;  %s214_s0 = sld [smem:[#allocation4 + %s213_s21]]  ;;  %s190_s30 = scalar_lea.vmem [#allocation5], %s189_s8 }
  0x65   : > { %187 = vst [vmem:[#allocation2 + $0x1] sm:$0x1] %v186_v1  ;;  %v191_v2 = vld [vmem:[%s190_s30] sm:$0x1]  ;;  %s195_s5 = scalar_lea.vmem [#allocation5], %s194_s13  ;;  %s173_s28 = sand.u32 1, %s556_s23  }
  0x66   : > { %192 = vst [vmem:[#allocation2 + $0x2] sm:$0x1] %v191_v2  ;;  %v196_v3 = vld [vmem:[%s195_s5] sm:$0x1]  ;;  %s200_s10 = scalar_lea.vmem [#allocation5], %s199_s16  ;;  %s333_s8 = sshll.u32 %s173_s28, 3 }
  0x67   : > { %197 = vst [vmem:[#allocation2 + $0x3] sm:$0x1] %v196_v3  ;;  %v201_v4 = vld [vmem:[%s200_s10] sm:$0x1]  ;;  %s205_s15 = scalar_lea.vmem [#allocation5], %s204_s18  ;;  %s175_s13 = scalar_lea.vmem [#allocation10], %s333_s8 }
  0x68   : > { %202 = vst [vmem:[#allocation2 + $0x4] sm:$0x1] %v201_v4  ;;  %v206_v5 = vld [vmem:[%s205_s15] sm:$0x1]  ;;  %s210_s12 = scalar_lea.vmem [#allocation5], %s209_s20  ;;  %s237_s17 = sshll.u32 %s175_s13, 4  ;;  %s745_s17 = int_to_ptr.vmem [resolvable:$true] %s237_s17 }
  0x69   : > { %207 = vst [vmem:[#allocation2 + $0x5] sm:$0x1] %v206_v5  ;;  %v211_v6 = vld [vmem:[%s210_s12] sm:$0x1]  ;;  %s336_s19 = sshll.u32 %s564_s25, 7  ;;  %s223_s11 = scalar_lea.sflag [#allocation7], %s173_s28 }
  0x6a   : > { %212 = vst [vmem:[#allocation2 + $0x6] sm:$0x1] %v211_v6  ;;  %s215_s14 = scalar_lea.vmem [#allocation5], %s214_s0  ;;  %s750_s20 = scalar_lea.hbm %s798_s3, %s336_s19 }
  0x6b   : > { %v216_v7 = vld [vmem:[%s215_s14] sm:$0x1]  ;;  %s484_s21 = scalar_lea.vmem %s745_s17, 128  ;;  %s579_s25 = smov [#allocation10]  }
  0x6c   : > { %217 = vst [vmem:[#allocation2 + $0x7] sm:$0x1] %v216_v7  ;;  %p485_p2 = scmp.ne.s32.totalorder %s745_s17, %s484_s21  ;;  %s488_s9 = sshll.u32 %s579_s25, 4  ;;  %s489_s9 = int_to_ptr.vmem [resolvable:$false] %s488_s9 }
  0x6d   : > { %s490_s0 = scalar_lea.vmem %s489_s9, 256  ;;  %p491_p0 = scmp.lt.s32.totalorder %s745_s17, %s489_s9 }
  0x6e   : > { %p486_p11 = pnand %p485_p2, %p810_p4  ;;  %p492_p5 = scmp.lt.s32.totalorder %s490_s0, %s484_s21 }
  0x70   : > { %p487_p13 = pneg %p486_p11  ;;  %p493_p6 = por %p492_p5, %p491_p0 }
  0x72   : > { %p494_p8 = pnand %p493_p6, %p487_p13 }
  0x73   : > { %v218_v9 = vld [vmem:[#allocation2] sm:$0xff] }
  0x74   : > { %v220_v10 = vadd.f32 %v219_v8, %v218_v9 }
  0x76   : > { %221 = vst [vmem:[%s175_s13] sm:$0xff] %v220_v10 }
  0x77   : > { %497 = shalt.err (!%p494_p8)
}
  0x78   : > { %s498_s30 = scalar_lea.hbm %s750_s20, 128  ;;  %s502_s15 = scalar_lea.hbm %s798_s3, 256 }
  0x79   : > { %p499_p9 = scmp.ne.s32.totalorder %s750_s20, %s498_s30  ;;  %p503_p1 = scmp.lt.u32.totalorder %s750_s20, %s798_s3 }
  0x7a   : > { %p504_p3 = scmp.lt.u32.totalorder %s502_s15, %s498_s30  ;;  %p506_p2 = scmp.lt.u32.totalorder %s498_s30, %s750_s20 }
  0x7b   : > { %p500_p10 = pnand %p499_p9, %p810_p4 }
  0x7c   : > { %p505_p7 = por %p504_p3, %p503_p1 }
  0x7d   : > { %p501_p12 = pneg %p500_p10 }
  0x7e   : > { %p507_p11 = por %p506_p2, %p505_p7 }
  0x80   : > { %p508_p13 = pnand %p507_p11, %p501_p12 }
  0x82   : > { %511 = shalt.err (!%p508_p13)
}
  0x83   : > { %347 = dma.vmem_to_hbm [thread:$0]  (%p810_p4), %s745_s17, 128, %s750_s20, %s223_s11  }
  0x84 PF: > { %p364_p0 = scmp.ge.s32.totalorder %s572_s27, 2  ;;  %s249_s14 = sand.u32 1, %s552_s22  }
  0x85   : > { %p811_p5 = scmp.ne.s32.totalorder %s804_s6, 0  ;;  %s250_s8 = scalar_lea.sflag [#allocation7], %s249_s14 }
  0x87   : > { %p357_p6 = pnand %p364_p0, %p811_p5 }
  0x89   : > { %547 = dma.done.wait (!%p357_p6), %s250_s8, 128  }
  0x8a   : > { %549 = vsyncadd (!%p357_p6), %s250_s8, 4294967168  ;;  %s22_s27 = sadd.s32 1, %s572_s27   ;;  %s812_s22 = smov %s556_s23 }
  0x8b   : > { %p19_p8 = scmp.ge.s32.totalorder %s22_s27, 4   ;;  %s813_s23 = smov %s560_s24 }
  0x8c   : > { %s814_s24 = smov %s665_s7  ;;  %s815_s25 = smov %s568_s26 }
  0x8d   : > { %s816_s26 = smov %s818_s29  ;;  %21 = sbr.rel (!%p19_p8) target bundleno = 18 (0x12), region = 78 }
  0x94   :  { %255 = vsyncpa [#allocation6], 1 }
  0x95   :  { %257 = vsyncpa [#allocation6 + $0x1], 1 }
  0x96   :  { %258 = vsyncpa [#allocation9], 1 }
  0x97   :  { %259 = vsyncpa [#allocation7], 1 }
  0x98   :  { %261 = vsyncpa [#allocation7 + $0x1], 1 }

</bundles_post_ra>
